<compile_context>
chip_gen: v5e
topology: v5e:2x2
jax: 0.10.0
libtpu: 0.0.40
codegen_flags: <defaults>
</compile_context>

<pallas_src>
import jax
import jax.numpy as jnp
from jax.experimental import pallas as pl
from jax.experimental.pallas import tpu as pltpu


def _locked_dropout_kernel(mask_ref, x_ref, o_ref):
    # mask_ref: (1, BH) float32, already scaled by 1/keep_prob.
    # x_ref / o_ref: (TS, BH)
    x = x_ref[...].astype(jnp.float32)
    o_ref[...] = (x * mask_ref[...]).astype(o_ref.dtype)


def locked_dropout(x, dropout=0.5, *, key=None, training=True):
    """JAX/Pallas equivalent of LockedDropout.forward(x, dropout)."""
    if not training or dropout == 0.0:
        return x
    if key is None:
        key = jax.random.PRNGKey(0)

    S, B, H = x.shape
    BH = B * H
    keep_prob = 1.0 - float(dropout)

    # One "locked" mask shared across the whole sequence, pre-scaled.
    mask = (
        jax.random.bernoulli(key, p=keep_prob, shape=(1, BH)).astype(jnp.float32)
        / jnp.float32(keep_prob)
    )

    # Lane-dense 2-D view of x: (S, B*H). Pure layout plumbing.
    x2 = x.reshape(S, BH)

    # Tile many sequence rows per grid step; target ~2 MiB blocks so a
    # double-buffered input + output comfortably fits every generation's
    # scoped VMEM (v7x: 32 MiB default / 64 MiB physical).
    row_bytes = BH * x2.dtype.itemsize
    target_bytes = 2 * 1024 * 1024
    ts = max(1, target_bytes // row_bytes)
    if ts >= S:
        ts = S                      # whole array in one block
    elif ts >= 8:
        ts = (ts // 8) * 8          # keep sublane (8) alignment
    else:
        ts = min(8, S)

    grid = (pl.cdiv(S, ts),)

    out2 = pl.pallas_call(
        _locked_dropout_kernel,
        out_shape=jax.ShapeDtypeStruct((S, BH), x.dtype),
        grid=grid,
        in_specs=[
            # Same mask block every grid step -> stays resident in VMEM.
            pl.BlockSpec((1, BH), lambda i: (0, 0)),
            pl.BlockSpec((ts, BH), lambda i: (i, 0)),
        ],
        out_specs=pl.BlockSpec((ts, BH), lambda i: (i, 0)),
        compiler_params=pltpu.CompilerParams(
            # No cross-step carry: safe to shard seq axis across TCs on v7x.
            dimension_semantics=("parallel",),
        ),
    )(mask, x2)

    return out2.reshape(S, B, H)


if __name__ == "__main__":
    # Small shapes consistent with the module: x is (seq_len, batch, hidden).
    S, B, H = 8, 8, 128
    dropout = 0.5
    keep_prob = 1.0 - dropout

    root = jax.random.PRNGKey(0)
    data_key, mask_key = jax.random.split(root)
    x = jax.random.normal(data_key, (S, B, H), dtype=jnp.float32)

    out = locked_dropout(x, dropout=dropout, key=mask_key, training=True)
    out = jax.block_until_ready(out)

    # Sanity checks on locked-dropout semantics.
    # 1) Every output element is either 0 or x / keep_prob.
    scaled = x / keep_prob
    is_zero = jnp.isclose(out, 0.0, atol=1e-6)
    is_scaled = jnp.isclose(out, scaled, atol=1e-5)
    assert bool(jnp.all(is_zero | is_scaled)), "values not in {0, x/keep_prob}"
    # 2) The dropout pattern is identical across the sequence axis ("locked").
    pattern = is_scaled  # (S, B, H) boolean keep-pattern
    assert bool(jnp.all(pattern == pattern[0:1])), "mask not shared across seq"

    # Eval-mode / dropout=0 pass-through.
    out_eval = locked_dropout(x, dropout=dropout, training=False)
    assert bool(jnp.all(out_eval == x))
    out_zero = locked_dropout(x, dropout=0.0, training=True)
    assert bool(jnp.all(out_zero == x))

    print("KERNEL_OK")
</pallas_src>

<mosaic_0001>
module attributes {stable_mosaic.version = 11 : i64} {
  func.func @_locked_dropout_kernel(%arg0: i32, %arg1: memref<1x1024xf32, #tpu.memory_space<vmem>>, %arg2: memref<8x1024xf32, #tpu.memory_space<vmem>>, %arg3: memref<8x1024xf32, #tpu.memory_space<vmem>>) attributes {dimension_semantics = [#tpu.dimension_semantics<parallel>], iteration_bounds = array<i64: 1>, scalar_prefetch = 0 : i64, scratch_operands = 0 : i64, tpu.core_type = #tpu.core_type<tc>, window_params = [{pipeline_mode = #tpu.pipeline_mode<synchronous>, transform_indices = @transform_0, window_bounds = array<i64: 1, 1024>}, {transform_indices = @transform_1, window_bounds = array<i64: 8, 1024>}, {transform_indices = @transform_2, window_bounds = array<i64: 8, 1024>}]} {
    %c0 = arith.constant 0 : index
    %c0_0 = arith.constant 0 : index
    %0 = vector.load %arg2[%c0, %c0_0] : memref<8x1024xf32, #tpu.memory_space<vmem>>, vector<8x1024xf32>
    %c0_1 = arith.constant 0 : index
    %c0_2 = arith.constant 0 : index
    %1 = vector.load %arg1[%c0_1, %c0_2] : memref<1x1024xf32, #tpu.memory_space<vmem>>, vector<1x1024xf32>
    %2 = vector.broadcast %1 : vector<1x1024xf32> to vector<8x1024xf32>
    %3 = arith.mulf %0, %2 : vector<8x1024xf32>
    %c0_3 = arith.constant 0 : index
    %c0_4 = arith.constant 0 : index
    %4 = vector.load %arg3[%c0_3, %c0_4] : memref<8x1024xf32, #tpu.memory_space<vmem>>, vector<8x1024xf32>
    tpu.vector_store %arg3[%c0_3, %c0_4], %3 {strides = array<i32>} : memref<8x1024xf32, #tpu.memory_space<vmem>>, vector<8x1024xf32>,
    return
  }
  func.func @transform_0(%arg0: i32) -> (i32, i32) {
    %c0_i32 = arith.constant 0 : i32
    %c0_i32_0 = arith.constant 0 : i32
    %c0_i32_1 = arith.constant 0 : i32
    return %c0_i32, %c0_i32_0 : i32, i32
  }
  func.func @transform_1(%arg0: i32) -> (i32, i32) {
    %c0_i32 = arith.constant 0 : i32
    %c0_i32_0 = arith.constant 0 : i32
    return %arg0, %c0_i32 : i32, i32
  }
  func.func @transform_2(%arg0: i32) -> (i32, i32) {
    %c0_i32 = arith.constant 0 : i32
    %c0_i32_0 = arith.constant 0 : i32
    return %arg0, %c0_i32 : i32, i32
  }
}

</mosaic_0001>

<bundles_post_ra>
// kernel: tpu_custom_call.1
= control target key start
LH: loop header
LB: loop body
LE: loop exit
PB: predicated region body
PF: predicated region fallthrough
CT: control target
= control target key end

     0   :  { %7 = vsyncpa [#allocation3], 0  ;;  %s208_s0 = inlined_call_operand.hbm [shape: f32[1,1024], index: 0, kind: input, shape index: {}]   ;;  %s209_s1 = inlined_call_operand.hbm [shape: f32[8,1024], index: 1, kind: input, shape index: {}]   ;;  %s210_s2 = inlined_call_operand.hbm [shape: f32[8,1024], index: 2, kind: output, shape index: {}]  }
   0x1   :  { %8 = vsyncpa [#allocation6], 0 }
   0x2   :  { %9 = vsyncpa [#allocation4], 0  ;;  %s15_s11 = sshll.u32 %s208_s0, 4  ;;  %s181_s12 = smov [#allocation2]   ;;  %s16_s11 = int_to_ptr.hbm [resolvable:$true] %s15_s11 }
   0x3   :  { %s17_s13 = sshll.u32 %s181_s12, 4  ;;  %s26_s16 = sshll.u32 %s209_s1, 4  ;;  %s18_s13 = int_to_ptr.vmem [resolvable:$true] %s17_s13  ;;  %s27_s16 = int_to_ptr.hbm [resolvable:$true] %s26_s16 }
   0x4   :  { %20 = dma.hbm_to_vmem [thread:$0]  %s16_s11, 128, %s18_s13, [#allocation3]  }
   0x5   :  { %s182_s17 = smov [#allocation5]  }
   0x6   :  { %s28_s18 = sshll.u32 %s182_s17, 4  ;;  %s29_s18 = int_to_ptr.vmem [resolvable:$true] %s28_s18 }
   0x7   :  { %31 = dma.hbm_to_vmem [thread:$0]  %s27_s16, 1024, %s29_s18, [#allocation6]  }
   0x8   :  { %175 = dma.done.wait [#allocation3], 128  }
   0x9   :  { %176 = vsyncadd [#allocation3], 4294967168 }
   0xa   :  { %177 = dma.done.wait [#allocation6], 1024  }
   0xb   :  { %178 = vsyncadd [#allocation6], 4294966272  ;;  %v40_v0 = vld [vmem:[#allocation5] sm:$0xff]  ;;  %v48_v1 = vld [vmem:[#allocation2] sm:$0xff]  ;;  %s183_s0 = smov [#allocation7]   ;;  %s89_s21 = sshll.u32 %s210_s2, 4  ;;  %s90_s21 = int_to_ptr.hbm [resolvable:$true] %s89_s21 }
   0xc   :  { %v41_v2 = vld [vmem:[#allocation5 + $0x8] sm:$0xff]  ;;  %v50_v3 = vperm.slane %v48_v1, 0  ;;  %v51_v4 = vperm.slane %v48_v1, 1  ;;  %v42_v5 = vld [vmem:[#allocation5 + $0x10] sm:$0xff]  ;;  %v52_v6 = vperm.slane %v48_v1, 2  ;;  %v43_v7 = vld [vmem:[#allocation5 + $0x18] sm:$0xff] }
   0xd   :  { %v53_v8 = vperm.slane %v48_v1, 3  ;;  %v44_v9 = vld [vmem:[#allocation5 + $0x20] sm:$0xff]  ;;  %v54_v10 = vperm.slane %v48_v1, 4  ;;  %v55_v11 = vperm.slane %v48_v1, 5  ;;  %v45_v15 = vld [vmem:[#allocation5 + $0x28] sm:$0xff]  ;;  %v56_v16 = vperm.slane %v48_v1, 6 }
   0xe   :  { %v66_v12 = vmul.f32 %v50_v3, %v40_v0  ;;  %v67_v13 = vmul.f32 %v51_v4, %v41_v2  ;;  %v68_v14 = vmul.f32 %v52_v6, %v42_v5  ;;  %v46_v18 = vld [vmem:[#allocation5 + $0x30] sm:$0xff]  ;;  %v57_v19 = vperm.slane %v48_v1, 7  ;;  %v47_v21 = vld [vmem:[#allocation5 + $0x38] sm:$0xff]  ;;  %s87_s1 = sshll.u32 %s183_s0, 4  ;;  %s88_s1 = int_to_ptr.vmem [resolvable:$true] %s87_s1 }
   0xf   :  { %v69_v17 = vmul.f32 %v53_v8, %v43_v7  ;;  %v70_v20 = vmul.f32 %v54_v10, %v44_v9  ;;  %v71_v22 = vmul.f32 %v55_v11, %v45_v15  ;;  %v72_v23 = vmul.f32 %v56_v16, %v46_v18 }
  0x10   :  { %74 = vst [vmem:[#allocation7] sm:$0xff] %v66_v12  ;;  %v73_v24 = vmul.f32 %v57_v19, %v47_v21 }
  0x11   :  { %75 = vst [vmem:[#allocation7 + $0x8] sm:$0xff] %v67_v13 }
  0x12   :  { %76 = vst [vmem:[#allocation7 + $0x10] sm:$0xff] %v68_v14 }
  0x13   :  { %77 = vst [vmem:[#allocation7 + $0x18] sm:$0xff] %v69_v17 }
  0x14   :  { %78 = vst [vmem:[#allocation7 + $0x20] sm:$0xff] %v70_v20 }
  0x15   :  { %79 = vst [vmem:[#allocation7 + $0x28] sm:$0xff] %v71_v22 }
  0x16   :  { %80 = vst [vmem:[#allocation7 + $0x30] sm:$0xff] %v72_v23 }
  0x17   :  { %81 = vst [vmem:[#allocation7 + $0x38] sm:$0xff] %v73_v24 }
  0x18   :  { %92 = dma.vmem_to_hbm [thread:$0]  %s88_s1, 1024, %s90_s21, [#allocation4]  }
  0x19   :  { %179 = dma.done.wait [#allocation4], 1024  }
  0x1a   :  { %180 = vsyncadd [#allocation4], 4294966272 }
  0x1b   :  { %97 = vsyncpa [#allocation3], 1 }
  0x1c   :  { %98 = vsyncpa [#allocation6], 1 }
  0x1d   :  { %99 = vsyncpa [#allocation4], 1 }

</bundles_post_ra>
